<compile_context>
chip_gen: v7x
topology: tpu7x:2x2x1
jax: 0.10.0
libtpu: 0.0.40
codegen_flags: <defaults>
</compile_context>

<pallas_src>
import functools

import jax
import jax.numpy as jnp
from jax.experimental import pallas as pl
from jax.experimental.pallas import tpu as pltpu

LANE = 128
H1 = 128          # fc1 output width (already lane-aligned)
H2_PAD = 128      # fc2 output width padded 64 -> 128


def _round_up(x, m):
    return ((x + m - 1) // m) * m


def dqn_kernel(x_ref, w1_ref, b1_ref, w2_ref, b2_ref, w3_ref, b3_ref, o_ref):
    # x tile and weights are bf16; accumulate in f32 on the MXU,
    # keep bias add + ReLU in f32.
    x = x_ref[...]
    h1 = jnp.dot(x, w1_ref[...], preferred_element_type=jnp.float32)
    h1 = jnp.maximum(h1 + b1_ref[...], 0.0)

    h2 = jnp.dot(h1.astype(jnp.bfloat16), w2_ref[...],
                 preferred_element_type=jnp.float32)
    h2 = jnp.maximum(h2 + b2_ref[...], 0.0)

    out = jnp.dot(h2.astype(jnp.bfloat16), w3_ref[...],
                  preferred_element_type=jnp.float32)
    o_ref[...] = (out + b3_ref[...]).astype(o_ref.dtype)


def init_linear(key, fan_in, fan_out):
    # PyTorch nn.Linear default init: U(-1/sqrt(fan_in), 1/sqrt(fan_in)).
    # Weight stored as (in, out) so y = x @ W + b.
    kw, kb = jax.random.split(key)
    bound = 1.0 / jnp.sqrt(jnp.float32(fan_in))
    w = jax.random.uniform(kw, (fan_in, fan_out), jnp.float32, -bound, bound)
    b = jax.random.uniform(kb, (1, fan_out), jnp.float32, -bound, bound)
    return w, b


def init_dqn_params(key, input_dim, output_dim):
    k1, k2, k3 = jax.random.split(key, 3)
    w1, b1 = init_linear(k1, input_dim, 128)
    w2, b2 = init_linear(k2, 128, 64)
    w3, b3 = init_linear(k3, 64, output_dim)
    return (w1, b1, w2, b2, w3, b3)


def prepare_params(params, input_dim, output_dim):
    """Pad feature dims to 128 lanes and cast matmul operands to bf16 (once)."""
    w1, b1, w2, b2, w3, b3 = params
    in_pad = _round_up(max(input_dim, 1), LANE)
    out_pad = _round_up(max(output_dim, 1), LANE)

    w1p = jnp.zeros((in_pad, H1), jnp.bfloat16).at[:input_dim, :].set(
        w1.astype(jnp.bfloat16))
    b1p = b1.astype(jnp.float32)                                   # (1, 128)

    w2p = jnp.zeros((H1, H2_PAD), jnp.bfloat16).at[:, :64].set(
        w2.astype(jnp.bfloat16))
    b2p = jnp.zeros((1, H2_PAD), jnp.float32).at[:, :64].set(b2)

    w3p = jnp.zeros((H2_PAD, out_pad), jnp.bfloat16).at[:64, :output_dim].set(
        w3.astype(jnp.bfloat16))
    b3p = jnp.zeros((1, out_pad), jnp.float32).at[:, :output_dim].set(b3)
    return (w1p, b1p, w2p, b2p, w3p, b3p)


@functools.partial(jax.jit, static_argnums=(2, 3))
def dqn_forward(x, prepared_params, output_dim, tile_b=512):
    """x: (B, input_dim) f32. Returns (B, output_dim) f32."""
    w1, b1, w2, b2, w3, b3 = prepared_params
    B, in_dim = x.shape
    in_pad = w1.shape[0]
    out_pad = w3.shape[1]

    # Batch tile: multiple of 8 sublanes, big enough to pipeline, but never
    # bigger than the (padded) batch so tiny batches stay a single grid step.
    tb = min(tile_b, _round_up(B, 8))
    b_pad = _round_up(B, tb)

    # Pad batch + feature dims, cast x to bf16 (halves the dominant HBM stream).
    xp = jnp.pad(x.astype(jnp.bfloat16),
                 ((0, b_pad - B), (0, in_pad - in_dim)))

    const = lambda i: (0, 0)  # weights/biases resident across grid steps
    out = pl.pallas_call(
        dqn_kernel,
        out_shape=jax.ShapeDtypeStruct((b_pad, out_pad), jnp.float32),
        grid=(b_pad // tb,),
        in_specs=[
            pl.BlockSpec((tb, in_pad), lambda i: (i, 0)),   # x tile (pipelined)
            pl.BlockSpec((in_pad, H1), const),              # w1
            pl.BlockSpec((1, H1), const),                   # b1
            pl.BlockSpec((H1, H2_PAD), const),              # w2
            pl.BlockSpec((1, H2_PAD), const),               # b2
            pl.BlockSpec((H2_PAD, out_pad), const),         # w3
            pl.BlockSpec((1, out_pad), const),              # b3
        ],
        out_specs=pl.BlockSpec((tb, out_pad), lambda i: (i, 0)),
        compiler_params=pltpu.CompilerParams(
            dimension_semantics=("parallel",)),
    )(xp, w1, b1, w2, b2, w3, b3)

    return out[:B, :output_dim]


if __name__ == "__main__":
    key = jax.random.PRNGKey(0)
    kx, kp = jax.random.split(key)

    batch = 8
    input_dim = 32
    output_dim = 8

    x = jax.random.normal(kx, (batch, input_dim), jnp.float32)
    params = init_dqn_params(kp, input_dim, output_dim)
    prepared = prepare_params(params, input_dim, output_dim)

    out = dqn_forward(x, prepared, output_dim)
    jax.block_until_ready(out)
    assert out.shape == (batch, output_dim)

    w1, b1, w2, b2, w3, b3 = params

    # Reference 1: mirror the kernel's bf16 quantization exactly (f32 accum).
    def q(a):
        return a.astype(jnp.bfloat16).astype(jnp.float32)
    h1 = jnp.maximum(q(x) @ q(w1) + b1, 0.0)
    h2 = jnp.maximum(q(h1) @ q(w2) + b2, 0.0)
    ref_bf16 = q(h2) @ q(w3) + b3
    assert jnp.allclose(out, ref_bf16, atol=1e-2, rtol=1e-2), "bf16-ref mismatch"

    # Reference 2: full-precision PyTorch-equivalent forward, loose tolerance
    # to cover the bf16 matmul inputs.
    h1f = jnp.maximum(x @ w1 + b1, 0.0)
    h2f = jnp.maximum(h1f @ w2 + b2, 0.0)
    ref_f32 = h2f @ w3 + b3
    assert jnp.allclose(out, ref_f32, atol=1e-1, rtol=1e-1), "f32-ref mismatch"

    print("KERNEL_OK")
</pallas_src>

<mosaic_0001>
module attributes {stable_mosaic.version = 11 : i64} {
  func.func @dqn_kernel(%arg0: i32, %arg1: memref<8x128xbf16, #tpu.memory_space<vmem>>, %arg2: memref<128x128xbf16, #tpu.memory_space<vmem>>, %arg3: memref<1x128xf32, #tpu.memory_space<vmem>>, %arg4: memref<128x128xbf16, #tpu.memory_space<vmem>>, %arg5: memref<1x128xf32, #tpu.memory_space<vmem>>, %arg6: memref<128x128xbf16, #tpu.memory_space<vmem>>, %arg7: memref<1x128xf32, #tpu.memory_space<vmem>>, %arg8: memref<8x128xf32, #tpu.memory_space<vmem>>) attributes {dimension_semantics = [#tpu.dimension_semantics<parallel>], iteration_bounds = array<i64: 1>, scalar_prefetch = 0 : i64, scratch_operands = 0 : i64, tpu.core_type = #tpu.core_type<tc>, window_params = [{transform_indices = @transform_0, window_bounds = array<i64: 8, 128>}, {pipeline_mode = #tpu.pipeline_mode<synchronous>, transform_indices = @transform_1, window_bounds = array<i64: 128, 128>}, {pipeline_mode = #tpu.pipeline_mode<synchronous>, transform_indices = @transform_2, window_bounds = array<i64: 1, 128>}, {pipeline_mode = #tpu.pipeline_mode<synchronous>, transform_indices = @transform_3, window_bounds = array<i64: 128, 128>}, {pipeline_mode = #tpu.pipeline_mode<synchronous>, transform_indices = @transform_4, window_bounds = array<i64: 1, 128>}, {pipeline_mode = #tpu.pipeline_mode<synchronous>, transform_indices = @transform_5, window_bounds = array<i64: 128, 128>}, {pipeline_mode = #tpu.pipeline_mode<synchronous>, transform_indices = @transform_6, window_bounds = array<i64: 1, 128>}, {transform_indices = @transform_7, window_bounds = array<i64: 8, 128>}]} {
    %c0 = arith.constant 0 : index
    %c0_0 = arith.constant 0 : index
    %0 = vector.load %arg1[%c0, %c0_0] : memref<8x128xbf16, #tpu.memory_space<vmem>>, vector<8x128xbf16>
    %c0_1 = arith.constant 0 : index
    %c0_2 = arith.constant 0 : index
    %1 = vector.load %arg2[%c0_1, %c0_2] : memref<128x128xbf16, #tpu.memory_space<vmem>>, vector<128x128xbf16>
    %cst = arith.constant dense<0.000000e+00> : vector<8x128xf32>
    %2 = tpu.matmul %0, %1, %cst {dimension_numbers = #tpu.dot_dimension_numbers<[1], [0], [0], [1], [0, 0, 1, 1], [], []>} : vector<8x128xbf16>, vector<128x128xbf16>, vector<8x128xf32> -> vector<8x128xf32>
    %c0_3 = arith.constant 0 : index
    %c0_4 = arith.constant 0 : index
    %3 = vector.load %arg3[%c0_3, %c0_4] : memref<1x128xf32, #tpu.memory_space<vmem>>, vector<1x128xf32>
    %4 = vector.broadcast %3 : vector<1x128xf32> to vector<8x128xf32>
    %5 = arith.addf %2, %4 : vector<8x128xf32>
    %cst_5 = arith.constant 0.000000e+00 : f32
    %6 = vector.broadcast %cst_5 : f32 to vector<8x128xf32>
    %7 = arith.maximumf %5, %6 : vector<8x128xf32>
    %8 = arith.truncf %7 : vector<8x128xf32> to vector<8x128xbf16>
    %c0_6 = arith.constant 0 : index
    %c0_7 = arith.constant 0 : index
    %9 = vector.load %arg4[%c0_6, %c0_7] : memref<128x128xbf16, #tpu.memory_space<vmem>>, vector<128x128xbf16>
    %cst_8 = arith.constant dense<0.000000e+00> : vector<8x128xf32>
    %10 = tpu.matmul %8, %9, %cst_8 {dimension_numbers = #tpu.dot_dimension_numbers<[1], [0], [0], [1], [0, 0, 1, 1], [], []>} : vector<8x128xbf16>, vector<128x128xbf16>, vector<8x128xf32> -> vector<8x128xf32>
    %c0_9 = arith.constant 0 : index
    %c0_10 = arith.constant 0 : index
    %11 = vector.load %arg5[%c0_9, %c0_10] : memref<1x128xf32, #tpu.memory_space<vmem>>, vector<1x128xf32>
    %12 = vector.broadcast %11 : vector<1x128xf32> to vector<8x128xf32>
    %13 = arith.addf %10, %12 : vector<8x128xf32>
    %cst_11 = arith.constant 0.000000e+00 : f32
    %14 = vector.broadcast %cst_11 : f32 to vector<8x128xf32>
    %15 = arith.maximumf %13, %14 : vector<8x128xf32>
    %16 = arith.truncf %15 : vector<8x128xf32> to vector<8x128xbf16>
    %c0_12 = arith.constant 0 : index
    %c0_13 = arith.constant 0 : index
    %17 = vector.load %arg6[%c0_12, %c0_13] : memref<128x128xbf16, #tpu.memory_space<vmem>>, vector<128x128xbf16>
    %cst_14 = arith.constant dense<0.000000e+00> : vector<8x128xf32>
    %18 = tpu.matmul %16, %17, %cst_14 {dimension_numbers = #tpu.dot_dimension_numbers<[1], [0], [0], [1], [0, 0, 1, 1], [], []>} : vector<8x128xbf16>, vector<128x128xbf16>, vector<8x128xf32> -> vector<8x128xf32>
    %c0_15 = arith.constant 0 : index
    %c0_16 = arith.constant 0 : index
    %19 = vector.load %arg7[%c0_15, %c0_16] : memref<1x128xf32, #tpu.memory_space<vmem>>, vector<1x128xf32>
    %20 = vector.broadcast %19 : vector<1x128xf32> to vector<8x128xf32>
    %21 = arith.addf %18, %20 : vector<8x128xf32>
    %c0_17 = arith.constant 0 : index
    %c0_18 = arith.constant 0 : index
    %22 = vector.load %arg8[%c0_17, %c0_18] : memref<8x128xf32, #tpu.memory_space<vmem>>, vector<8x128xf32>
    tpu.vector_store %arg8[%c0_17, %c0_18], %21 {strides = array<i32>} : memref<8x128xf32, #tpu.memory_space<vmem>>, vector<8x128xf32>,
    return
  }
  func.func @transform_0(%arg0: i32) -> (i32, i32) {
    %c0_i32 = arith.constant 0 : i32
    %c0_i32_0 = arith.constant 0 : i32
    return %arg0, %c0_i32 : i32, i32
  }
  func.func @transform_1(%arg0: i32) -> (i32, i32) {
    %c0_i32 = arith.constant 0 : i32
    %c0_i32_0 = arith.constant 0 : i32
    %c0_i32_1 = arith.constant 0 : i32
    return %c0_i32, %c0_i32_0 : i32, i32
  }
  func.func @transform_2(%arg0: i32) -> (i32, i32) {
    %c0_i32 = arith.constant 0 : i32
    %c0_i32_0 = arith.constant 0 : i32
    %c0_i32_1 = arith.constant 0 : i32
    return %c0_i32, %c0_i32_0 : i32, i32
  }
  func.func @transform_3(%arg0: i32) -> (i32, i32) {
    %c0_i32 = arith.constant 0 : i32
    %c0_i32_0 = arith.constant 0 : i32
    %c0_i32_1 = arith.constant 0 : i32
    return %c0_i32, %c0_i32_0 : i32, i32
  }
  func.func @transform_4(%arg0: i32) -> (i32, i32) {
    %c0_i32 = arith.constant 0 : i32
    %c0_i32_0 = arith.constant 0 : i32
    %c0_i32_1 = arith.constant 0 : i32
    return %c0_i32, %c0_i32_0 : i32, i32
  }
  func.func @transform_5(%arg0: i32) -> (i32, i32) {
    %c0_i32 = arith.constant 0 : i32
    %c0_i32_0 = arith.constant 0 : i32
    %c0_i32_1 = arith.constant 0 : i32
    return %c0_i32, %c0_i32_0 : i32, i32
  }
  func.func @transform_6(%arg0: i32) -> (i32, i32) {
    %c0_i32 = arith.constant 0 : i32
    %c0_i32_0 = arith.constant 0 : i32
    %c0_i32_1 = arith.constant 0 : i32
    return %c0_i32, %c0_i32_0 : i32, i32
  }
  func.func @transform_7(%arg0: i32) -> (i32, i32) {
    %c0_i32 = arith.constant 0 : i32
    %c0_i32_0 = arith.constant 0 : i32
    return %arg0, %c0_i32 : i32, i32
  }
}

</mosaic_0001>

<bundles_post_ra>
// kernel: dqn_forward.1
= control target key start
LH: loop header
LB: loop body
LE: loop exit
PB: predicated region body
PF: predicated region fallthrough
CT: control target
= control target key end

     0   :  { %12 = vsyncpa [#allocation3], 0  ;;  %s818_s0 = inlined_call_operand.vmem [shape: bf16[8,128], index: 0, kind: input, shape index: {}]   ;;  %s819_s1 = inlined_call_operand.hbm [shape: bf16[128,128], index: 1, kind: input, shape index: {}]   ;;  %s820_s2 = inlined_call_operand.vmem [shape: f32[1,128], index: 2, kind: input, shape index: {}]   ;;  %s821_s3 = inlined_call_operand.hbm [shape: bf16[128,128], index: 3, kind: input, shape index: {}]   ;;  %s822_s4 = inlined_call_operand.vmem [shape: f32[1,128], index: 4, kind: input, shape index: {}]   ;;  %s823_s5 = inlined_call_operand.hbm [shape: bf16[128,128], index: 5, kind: input, shape index: {}]   ;;  %s824_s6 = inlined_call_operand.vmem [shape: f32[1,128], index: 6, kind: input, shape index: {}]   ;;  %s825_s7 = inlined_call_operand.hbm [shape: f32[8,128], index: 7, kind: output, shape index: {}]  }
   0x1   :  { %13 = vsyncpa [#allocation6], 0 }
   0x2   :  { %14 = vsyncpa [#allocation4], 0  ;;  %s664_s24 = smov [#allocation5]   ;;  %s665_s26 = smov [#allocation2]  }
   0x3   :  { %s36_s25 = sshll.u32 %s664_s24, 4  ;;  %s22_s27 = sshll.u32 %s665_s26, 4  ;;  %s37_s25 = int_to_ptr.vmem [resolvable:$true] %s36_s25  ;;  %s712_s27 = int_to_ptr.vmem [resolvable:$true] %s22_s27 }
   0x4   :  { %s570_s30 = scalar_lea.hbm %s821_s3, 1024 }
   0x5   :  { %p571_p0 = scmp.ne.s32.totalorder %s821_s3, %s570_s30  ;;  %p574_p1 = scmp.lt.u32.totalorder %s570_s30, %s821_s3 }
   0x7   :  { %p576_p2 = pnand %p574_p1, %p571_p0 }
   0x9   :  { %579 = shalt.err (!%p576_p2)
}
   0xa   :  { %s580_s12 = scalar_lea.vmem %s37_s25, 1024  ;;  %p585_p4 = scmp.lt.s32.totalorder %s37_s25, %s37_s25 }
   0xb   :  { %p581_p3 = scmp.ne.s32.totalorder %s37_s25, %s580_s12  ;;  %p586_p5 = scmp.lt.s32.totalorder %s580_s12, %s580_s12 }
   0xd   :  { %p587_p6 = por %p586_p5, %p585_p4 }
   0xf   :  { %p588_p7 = pnand %p587_p6, %p581_p3 }
  0x11   :  { %591 = shalt.err (!%p588_p7)
}
  0x12   :  { %s666_s13 = smov 64   ;;  %s667_s14 = smov 4  }
  0x13   :  { %42 = dma.hbm_to_vmem [thread:$0]  %s821_s3, 1024, %s37_s25, [#allocation6], %s666_s13, %s666_s13, %s667_s14  }
  0x14   :  { %s592_s19 = scalar_lea.hbm %s819_s1, 1024 }
  0x15   :  { %p593_p8 = scmp.ne.s32.totalorder %s819_s1, %s592_s19  ;;  %p596_p9 = scmp.lt.u32.totalorder %s592_s19, %s819_s1 }
  0x17   :  { %p598_p10 = pnand %p596_p9, %p593_p8 }
  0x19   :  { %601 = shalt.err (!%p598_p10)
}
  0x1a   :  { %s602_s24 = scalar_lea.vmem %s712_s27, 1024  ;;  %p607_p12 = scmp.lt.s32.totalorder %s712_s27, %s712_s27 }
  0x1b   :  { %p603_p11 = scmp.ne.s32.totalorder %s712_s27, %s602_s24  ;;  %p608_p13 = scmp.lt.s32.totalorder %s602_s24, %s602_s24 }
  0x1d   :  { %p609_p0 = por %p608_p13, %p607_p12 }
  0x1f   :  { %p610_p1 = pnand %p609_p0, %p603_p11 }
  0x21   :  { %613 = shalt.err (!%p610_p1)
}
  0x22   :  { %28 = dma.hbm_to_vmem [thread:$0]  %s819_s1, 1024, %s712_s27, [#allocation3], %s666_s13, %s666_s13, %s667_s14  }
  0x23   :  { %s668_s26 = smov [#allocation7]   ;;  %s614_s8 = scalar_lea.hbm %s823_s5, 1024 }
  0x24   :  { %s50_s28 = sshll.u32 %s668_s26, 4  ;;  %p615_p2 = scmp.ne.s32.totalorder %s823_s5, %s614_s8  ;;  %s51_s28 = int_to_ptr.vmem [resolvable:$true] %s50_s28 }
  0x25   :  { %p618_p3 = scmp.lt.u32.totalorder %s614_s8, %s823_s5 }
  0x27   :  { %p620_p4 = pnand %p618_p3, %p615_p2 }
  0x29   :  { %623 = shalt.err (!%p620_p4)
}
  0x2a   :  { %s624_s15 = scalar_lea.vmem %s51_s28, 1024  ;;  %p629_p6 = scmp.lt.s32.totalorder %s51_s28, %s51_s28 }
  0x2b   :  { %p625_p5 = scmp.ne.s32.totalorder %s51_s28, %s624_s15  ;;  %p630_p7 = scmp.lt.s32.totalorder %s624_s15, %s624_s15 }
  0x2d   :  { %p631_p8 = por %p630_p7, %p629_p6 }
  0x2f   :  { %p632_p9 = pnand %p631_p8, %p625_p5 }
  0x31   :  { %635 = shalt.err (!%p632_p9)
}
  0x32   :  { %56 = dma.hbm_to_vmem [thread:$0]  %s823_s5, 1024, %s51_s28, [#allocation6], %s666_s13, %s666_s13, %s667_s14  }
  0x33   :  { %658 = dma.done.wait [#allocation3], 1024  }
  0x34   :  { %659 = vsyncadd [#allocation3], 4294966272 }
  0x35   :  { %660 = dma.done.wait [#allocation6], 2048  }
  0x36   :  { %661 = vsyncadd [#allocation6], 4294965248  ;;  %v669_v0 = vmov 0.0   ;;  %vm670_vm0 = vmmov 0   ;;  %v546_v1 = vld [vmem:[#allocation2] sm:$0xff]   ;;  %v547_v2 = vld [vmem:[#allocation2 + $0x8] sm:$0xff]  }
  0x37   :  { %478 = vmatprep.subr.bf16.mxu0 %v669_v0  ;;  %494 = vmatprep.mubr.msk.bf16.mxu0 %vm670_vm0, %v669_v0  ;;  %v548_v3 = vld [vmem:[#allocation2 + $0x10] sm:$0xff]   ;;  %v554_v4 = vld [vmem:[#allocation5] sm:$0xff]   ;;  %v549_v5 = vld [vmem:[#allocation2 + $0x18] sm:$0xff]   ;;  %s671_s19 = smov [#allocation8]  }
  0x38   :  { %498 = vmatprep.subr.bf16.mxu1 %v669_v0  ;;  %514 = vmatprep.mubr.msk.bf16.mxu1 %vm670_vm0, %v669_v0  ;;  %v555_v6 = vld [vmem:[#allocation5 + $0x8] sm:$0xff]   ;;  %v550_v7 = vld [vmem:[#allocation2 + $0x20] sm:$0xff]   ;;  %v556_v8 = vld [vmem:[#allocation5 + $0x10] sm:$0xff]   ;;  %s414_s20 = sshll.u32 %s671_s19, 4  ;;  %s415_s20 = int_to_ptr.vmem [resolvable:$true] %s414_s20 }
  0x39   :  { %479 = vmatpush3.bf16.msra.mxu0 %v546_v1  ;;  %499 = vmatpush3.bf16.msra.mxu1 %v554_v4  ;;  %v551_v9 = vld [vmem:[#allocation2 + $0x28] sm:$0xff]   ;;  %v557_v10 = vld [vmem:[#allocation5 + $0x18] sm:$0xff]   ;;  %v552_v11 = vld [vmem:[#allocation2 + $0x30] sm:$0xff]   ;;  %p641_p11 = scmp.lt.s32.totalorder %s415_s20, %s415_s20 }
  0x3a   :  { %480 = vmatprep.subr.bf16.mxu0 %v669_v0  ;;  %500 = vmatprep.subr.bf16.mxu1 %v669_v0  ;;  %v558_v12 = vld [vmem:[#allocation5 + $0x20] sm:$0xff]   ;;  %v553_v13 = vld [vmem:[#allocation2 + $0x38] sm:$0xff]   ;;  %v559_v14 = vld [vmem:[#allocation5 + $0x28] sm:$0xff]  }
  0x3b   :  { %v69_v15 = vld [vmem:[%s818_s0] sm:$0xf]  ;;  %v560_v16 = vld [vmem:[#allocation5 + $0x30] sm:$0xff]   ;;  %v561_v17 = vld [vmem:[#allocation5 + $0x38] sm:$0xff]  }
  0x3c   :  { %v562_v18 = vld [vmem:[#allocation7] sm:$0xff]   ;;  %v563_v19 = vld [vmem:[#allocation7 + $0x8] sm:$0xff]   ;;  %v564_v20 = vld [vmem:[#allocation7 + $0x10] sm:$0xff]  }
  0x3d   :  { %481 = vmatpush3.bf16.msra.mxu0 %v547_v2  ;;  %501 = vmatpush3.bf16.msra.mxu1 %v555_v6  ;;  %v565_v21 = vld [vmem:[#allocation7 + $0x18] sm:$0xff]   ;;  %v566_v22 = vld [vmem:[#allocation7 + $0x20] sm:$0xff]   ;;  %v567_v23 = vld [vmem:[#allocation7 + $0x28] sm:$0xff]  }
  0x3e   :  { %482 = vmatprep.subr.bf16.mxu0 %v669_v0  ;;  %502 = vmatprep.subr.bf16.mxu1 %v669_v0  ;;  %v424_v24 = vld [vmem:[%s820_s2] ss:$0 sm:$0xff]  ;;  %v568_v32 = vld [vmem:[#allocation7 + $0x30] sm:$0xff]   ;;  %v569_v33 = vld [vmem:[#allocation7 + $0x38] sm:$0xff]  }
  0x3f   :  { %v433_v34 = vld [vmem:[%s822_s4] ss:$0 sm:$0xff]  ;;  %s636_s4 = scalar_lea.vmem %s415_s20, 128 }
  0x40   :  { %v442_v42 = vld [vmem:[%s824_s6] ss:$0 sm:$0xff]  ;;  %p637_p10 = scmp.ne.s32.totalorder %s415_s20, %s636_s4  ;;  %p642_p12 = scmp.lt.s32.totalorder %s636_s4, %s636_s4 }
  0x41   :  { %483 = vmatpush3.bf16.msra.mxu0 %v548_v3  ;;  %503 = vmatpush3.bf16.msra.mxu1 %v556_v8 }
  0x42   :  { %484 = vmatprep.subr.bf16.mxu0 %v669_v0  ;;  %504 = vmatprep.subr.bf16.mxu1 %v669_v0  ;;  %p643_p13 = por %p642_p12, %p641_p11 }
  0x44   :  { %p644_p0 = pnand %p643_p13, %p637_p10 }
  0x45   :  { %485 = vmatpush3.bf16.msra.mxu0 %v549_v5  ;;  %505 = vmatpush3.bf16.msra.mxu1 %v557_v10 }
  0x46   :  { %486 = vmatprep.subr.bf16.mxu0 %v669_v0  ;;  %506 = vmatprep.subr.bf16.mxu1 %v669_v0 }
  0x49   :  { %487 = vmatpush3.bf16.msra.mxu0 %v550_v7  ;;  %507 = vmatpush3.bf16.msra.mxu1 %v558_v12 }
  0x4a   :  { %488 = vmatprep.subr.bf16.mxu0 %v669_v0  ;;  %508 = vmatprep.subr.bf16.mxu1 %v669_v0 }
  0x4d   :  { %489 = vmatpush3.bf16.msra.mxu0 %v551_v9  ;;  %509 = vmatpush3.bf16.msra.mxu1 %v559_v14 }
  0x4e   :  { %490 = vmatprep.subr.bf16.mxu0 %v669_v0  ;;  %510 = vmatprep.subr.bf16.mxu1 %v669_v0 }
  0x51   :  { %491 = vmatpush3.bf16.msra.mxu0 %v552_v11  ;;  %511 = vmatpush3.bf16.msra.mxu1 %v560_v16 }
  0x52   :  { %492 = vmatprep.subr.bf16.mxu0 %v669_v0  ;;  %512 = vmatprep.subr.bf16.mxu1 %v669_v0 }
  0x55   :  { %493 = vmatpush3.bf16.msra.mxu0 %v553_v13  ;;  %513 = vmatpush3.bf16.msra.mxu1 %v561_v17 }
  0x56   :  { %518 = vmatprep.subr.bf16.mxu0 %v669_v0 }
  0x58   :  { %495 = vmatmul.mubr.bf16.vlgmr.msra.gmra.mrb[0].mxu0 %v69_v15 }
  0x59   :  { %534 = vmatprep.mubr.msk.bf16.mxu0 %vm670_vm0, %v669_v0  ;;  %519 = vmatpush3.bf16.msra.mxu0 %v562_v18 }
  0x5a   :  { %520 = vmatprep.subr.bf16.mxu0 %v669_v0 }
  0x5d   :  { %521 = vmatpush3.bf16.msra.mxu0 %v563_v19 }
  0x5e   :  { %522 = vmatprep.subr.bf16.mxu0 %v669_v0 }
  0x61   :  { %523 = vmatpush3.bf16.msra.mxu0 %v564_v20 }
  0x62   :  { %524 = vmatprep.subr.bf16.mxu0 %v669_v0 }
  0x65   :  { %525 = vmatpush3.bf16.msra.mxu0 %v565_v21 }
  0x66   :  { %526 = vmatprep.subr.bf16.mxu0 %v669_v0 }
  0x69   :  { %527 = vmatpush3.bf16.msra.mxu0 %v566_v22 }
  0x6a   :  { %528 = vmatprep.subr.bf16.mxu0 %v669_v0 }
  0x6d   :  { %529 = vmatpush3.bf16.msra.mxu0 %v567_v23 }
  0x6e   :  { %530 = vmatprep.subr.bf16.mxu0 %v669_v0 }
  0x71   :  { %531 = vmatpush3.bf16.msra.mxu0 %v568_v32 }
  0x72   :  { %532 = vmatprep.subr.bf16.mxu0 %v669_v0 }
  0x75   :  { %533 = vmatpush3.bf16.msra.mxu0 %v569_v33 }
 0x12b   :  { %v175_v25 = vpop.f32.mrb[0].mxu0 }
 0x12c   :  { %v176_v26 = vadd.f32 %v424_v24, %v175_v25  ;;  %v496_v27 = vpop.f32.mrb[1].mxu0 }
 0x12d   :  { %v178_v28 = vpop.f32.mrb[2].mxu0 }
 0x12e   :  { %v181_v29 = vmax.f32 %v176_v26, 0.0  ;;  %v497_v30 = vpop.f32.mrb[3].mxu0 }
 0x130   :  { %v182_v31 = vpack.c.bf16 %v181_v29, %v181_v29 }
 0x132   :  { %515 = vmatmul.mubr.bf16.vlgmr.msra.gmra.mrb[0].mxu1 %v182_v31 }
 0x205   :  { %v288_v35 = vpop.f32.mrb[0].mxu1 }
 0x206   :  { %v289_v36 = vadd.f32 %v433_v34, %v288_v35  ;;  %v516_v37 = vpop.f32.mrb[1].mxu1 }
 0x207   :  { %v291_v38 = vpop.f32.mrb[2].mxu1 }
 0x208   :  { %v294_v39 = vmax.f32 %v289_v36, 0.0  ;;  %v517_v40 = vpop.f32.mrb[3].mxu1 }
 0x20a   :  { %v295_v41 = vpack.c.bf16 %v294_v39, %v294_v39 }
 0x20c   :  { %535 = vmatmul.mubr.bf16.vlgmr.msra.gmra.mrb[4].mxu0 %v295_v41 }
 0x2df   :  { %v401_v43 = vpop.f32.mrb[4].mxu0 }
 0x2e0   :  { %v402_v44 = vadd.f32 %v442_v42, %v401_v43  ;;  %v536_v45 = vpop.f32.mrb[5].mxu0 }
 0x2e1   :  { %v404_v46 = vpop.f32.mrb[6].mxu0 }
 0x2e2   :  { %407 = vst [vmem:[#allocation8] sm:$0xff] %v402_v44  ;;  %v537_v47 = vpop.f32.mrb[7].mxu0 }
 0x2e3   :  { %647 = shalt.err (!%p644_p0)
}
 0x2e4   :  { %s648_s6 = scalar_lea.hbm %s825_s7, 128 }
 0x2e5   :  { %p649_p1 = scmp.ne.s32.totalorder %s825_s7, %s648_s6  ;;  %p652_p2 = scmp.lt.u32.totalorder %s648_s6, %s825_s7 }
 0x2e7   :  { %p654_p3 = pnand %p652_p2, %p649_p1 }
 0x2e9   :  { %657 = shalt.err (!%p654_p3)
}
 0x2ea   :  { %417 = dma.vmem_to_hbm [thread:$0]  %s415_s20, 128, %s825_s7, [#allocation4]  }
 0x2eb   :  { %662 = dma.done.wait [#allocation4], 128  }
 0x2ec   :  { %663 = vsyncadd [#allocation4], 4294967168 }
 0x2ed   :  { %421 = vsyncpa [#allocation3], 1 }
 0x2ee   :  { %422 = vsyncpa [#allocation6], 1 }
 0x2ef   :  { %423 = vsyncpa [#allocation4], 1 }

</bundles_post_ra>
